<compile_context>
chip_gen: v7x
topology: tpu7x:2x2x1
jax: 0.10.0
libtpu: 0.0.40
codegen_flags: <defaults>
</compile_context>

<pallas_src>
import jax
import jax.numpy as jnp
from jax.experimental import pallas as pl
from jax.experimental.pallas import tpu as pltpu


def _chunk_plan(rows, cols, itemsize):
    """Static (start, size) row-chunks for concurrent DMAs.

    Up to 8 chunks, each >= ~512 KiB, with sublane(8)-aligned starts so chunk
    boundaries respect TPU (8,128) tiling.  Degenerates to one whole-array DMA
    for small or oddly-shaped inputs.
    """
    total_bytes = rows * cols * itemsize
    target = int(min(8, max(1, total_bytes // (512 * 1024))))
    if target > 1 and rows % 8 == 0:
        n8 = rows // 8
        target = min(target, n8)
        chunk_rows = (-(-n8 // target)) * 8  # cdiv in units of 8 rows
    else:
        chunk_rows = rows
    bounds = []
    s = 0
    while s < rows:
        bounds.append((s, min(chunk_rows, rows - s)))
        s += chunk_rows
    return bounds


def _make_dma_copy_kernel(chunk_bounds):
    """Kernel: issue all chunk DMAs (HBM->HBM), then wait for completion."""

    def kernel(x_ref, o_ref, sem):
        copies = []
        for i, (start, size) in enumerate(chunk_bounds):
            cp = pltpu.make_async_copy(
                x_ref.at[pl.ds(start, size)],
                o_ref.at[pl.ds(start, size)],
                sem.at[i],
            )
            cp.start()
            copies.append(cp)
        # All chunks are now in flight; block until every DMA has landed.
        for cp in copies:
            cp.wait()

    return kernel


def _dma_copy(x2d: jax.Array) -> jax.Array:
    """Direct DMA copy of a 2-D array (no grid, no VMEM staging)."""
    rows, cols = x2d.shape
    itemsize = jnp.dtype(x2d.dtype).itemsize
    bounds = _chunk_plan(rows, cols, itemsize)
    return pl.pallas_call(
        _make_dma_copy_kernel(bounds),
        out_shape=jax.ShapeDtypeStruct((rows, cols), x2d.dtype),
        in_specs=[pl.BlockSpec(memory_space=pl.ANY)],
        out_specs=pl.BlockSpec(memory_space=pl.ANY),
        scratch_shapes=[pltpu.SemaphoreType.DMA((len(bounds),))],
        cost_estimate=pl.CostEstimate(
            flops=0,
            transcendentals=0,
            bytes_accessed=2 * rows * cols * itemsize,
        ),
    )(x2d)


def flatten_layer(x: jax.Array) -> jax.Array:
    """Equivalent of FlattenLayer.forward: x.view(x.shape[0], -1)."""
    n = x.shape[0]
    k = 1
    for d in x.shape[1:]:
        k *= d
    total = n * k

    if total % 128 == 0:
        # Lane-dense flat view: chunk slices are full-width contiguous runs.
        x2d = jnp.reshape(x, (total // 128, 128))
    else:
        # Feature size not a multiple of 128: copy the (N, K) view directly
        # (single contiguous DMA; no masked partial-lane stores involved).
        x2d = jnp.reshape(x, (n, k))

    out = _dma_copy(x2d)
    return jnp.reshape(out, (n, k))


if __name__ == "__main__":
    key = jax.random.PRNGKey(0)
    # Small NCHW input: batch=2, channels=4, H=W=16  ->  output (2, 1024).
    x = jax.random.normal(key, (2, 4, 16, 16), dtype=jnp.float32)

    y = flatten_layer(x)
    jax.block_until_ready(y)

    # Reference semantics: identical to x.reshape(N, -1) (torch .view ordering).
    y_ref = jnp.reshape(x, (x.shape[0], -1))
    assert y.shape == (2, 4 * 16 * 16), y.shape
    assert y.dtype == x.dtype
    assert bool(jnp.all(y == y_ref))

    # Also exercise the non-128-multiple path (K = 105).
    x2 = jax.random.normal(jax.random.PRNGKey(1), (2, 3, 5, 7), dtype=jnp.float32)
    y2 = flatten_layer(x2)
    jax.block_until_ready(y2)
    assert y2.shape == (2, 3 * 5 * 7)
    assert bool(jnp.all(y2 == jnp.reshape(x2, (2, -1))))

    print("KERNEL_OK")
</pallas_src>

<mosaic_0001>
module attributes {stable_mosaic.version = 11 : i64} {
  func.func @kernel(%arg0: memref<16x128xf32, #tpu.memory_space<any>>, %arg1: memref<16x128xf32, #tpu.memory_space<any>>, %arg2: memref<1x!tpu.dma_semaphore, #tpu.memory_space<semaphore_mem>>) attributes {dimension_semantics = [], scalar_prefetch = 0 : i64, scratch_operands = 1 : i64, tpu.core_type = #tpu.core_type<tc>} {
    %c0_i32 = arith.constant 0 : i32
    %c0_i32_0 = arith.constant 0 : i32
    %c0_i32_1 = arith.constant 0 : i32
    %0 = tpu.memref_slice %arg0[%c0_i32_0, %c0_i32_1] : memref<16x128xf32, #tpu.memory_space<any>> -> memref<16x128xf32, #tpu.memory_space<any>>
    %c0_i32_2 = arith.constant 0 : i32
    %c0_i32_3 = arith.constant 0 : i32
    %1 = tpu.memref_slice %arg1[%c0_i32_2, %c0_i32_3] : memref<16x128xf32, #tpu.memory_space<any>> -> memref<16x128xf32, #tpu.memory_space<any>>
    %2 = tpu.memref_slice %arg2[%c0_i32] : memref<1x!tpu.dma_semaphore, #tpu.memory_space<semaphore_mem>> -> memref<1x!tpu.dma_semaphore, #tpu.memory_space<semaphore_mem>>
    %3 = tpu.memref_squeeze %2 : memref<1x!tpu.dma_semaphore, #tpu.memory_space<semaphore_mem>> -> memref<!tpu.dma_semaphore, #tpu.memory_space<semaphore_mem>>
    tpu.enqueue_dma source(%0 : memref<16x128xf32, #tpu.memory_space<any>>) target(%1 : memref<16x128xf32, #tpu.memory_space<any>>) target_semaphore(%3 : memref<!tpu.dma_semaphore, #tpu.memory_space<semaphore_mem>>)
    %c0_i32_4 = arith.constant 0 : i32
    %c0_i32_5 = arith.constant 0 : i32
    %c0_i32_6 = arith.constant 0 : i32
    %4 = tpu.memref_slice %arg0[%c0_i32_5, %c0_i32_6] : memref<16x128xf32, #tpu.memory_space<any>> -> memref<16x128xf32, #tpu.memory_space<any>>
    %c0_i32_7 = arith.constant 0 : i32
    %c0_i32_8 = arith.constant 0 : i32
    %5 = tpu.memref_slice %arg1[%c0_i32_7, %c0_i32_8] : memref<16x128xf32, #tpu.memory_space<any>> -> memref<16x128xf32, #tpu.memory_space<any>>
    %6 = tpu.memref_slice %arg2[%c0_i32_4] : memref<1x!tpu.dma_semaphore, #tpu.memory_space<semaphore_mem>> -> memref<1x!tpu.dma_semaphore, #tpu.memory_space<semaphore_mem>>
    %7 = tpu.memref_squeeze %6 : memref<1x!tpu.dma_semaphore, #tpu.memory_space<semaphore_mem>> -> memref<!tpu.dma_semaphore, #tpu.memory_space<semaphore_mem>>
    tpu.wait_dma2 semaphore(%7 : memref<!tpu.dma_semaphore, #tpu.memory_space<semaphore_mem>>) src(%4 : memref<16x128xf32, #tpu.memory_space<any>>) dst(%5 : memref<16x128xf32, #tpu.memory_space<any>>)
    return
  }
}

</mosaic_0001>

<bundles_post_ra>
// kernel: tpu_custom_call.1
= control target key start
LH: loop header
LB: loop body
LE: loop exit
PB: predicated region body
PF: predicated region fallthrough
CT: control target
= control target key end

     0   :  { %s34_s6 = smov [#allocation2]   ;;  %s35_s7 = smov [#allocation3]   ;;  %s53_s0 = inlined_call_operand.hbm [shape: f32[16,128], index: 0, kind: input, shape index: {}]   ;;  %s54_s1 = inlined_call_operand.hbm [shape: f32[16,128], index: 1, kind: output, shape index: {}]  }
   0x1   :  { %s36_s8 = smov 0  }
   0x2   :  { %18 = dma.general %s53_s0, 256, %s54_s1, %s34_s6, %s35_s7, [#allocation4], %s36_s8, 0  }
   0x3   :  { %32 = dma.done.wait [#allocation2], 256 }
   0x4   :  { %33 = vsyncadd [#allocation2], 4294967040 }
   0x5   :  { %22 = vsyncmov [#allocation2] }
   0x8   :  { %s23_s13 = vpop.sfrf %22 }
   0x9   :  { %p28_p0 = scmp.ne.s32.totalorder %s23_s13, 0 }
   0xb   :  { %27 = shalt.err (%p28_p0)  }

</bundles_post_ra>
